<compile_context>
chip_gen: v5e
topology: v5e:2x2
jax: 0.10.0
libtpu: 0.0.40
codegen_flags: <defaults>
</compile_context>

<pallas_src>
import numpy as np
import jax
import jax.numpy as jnp
from jax.experimental import pallas as pl
from jax.experimental.pallas import tpu as pltpu


_TARGET_X_BYTES_PER_STEP = 2 * 1024 * 1024   # ~2 MiB of x per grid step
_FALLBACK_VMEM_LIMIT = 48 * 1024 * 1024      # safe on every generation incl. v7x (64 MiB/TC)


def _build_pe_table(max_seq_length: int, d_model: int) -> np.ndarray:
    """Sinusoidal PE table, identical to the PyTorch __init__ loop (vectorized)."""
    pos = np.arange(max_seq_length, dtype=np.float64)[:, None]      # (L, 1)
    i = np.arange(d_model, dtype=np.float64)[None, :]               # (1, D)
    exponent = np.where(i % 2 == 0, i, i - 1) / d_model
    angle = pos / np.power(10000.0, exponent)
    pe = np.where(i % 2 == 0, np.sin(angle), np.cos(angle))
    return pe.astype(np.float32)


def _vmem_limit_bytes() -> int:
    """Per-generation scoped-VMEM limit with margin (v5e/v6e: 128 MiB, v7x: 64 MiB/TC)."""
    try:
        return int(pltpu.get_tpu_info().vmem_capacity_bytes * 3 // 4)
    except Exception:
        return _FALLBACK_VMEM_LIMIT


def _choose_batch_tile(B: int, x_row_bytes: int) -> int:
    """Batch-tile size: ~2 MiB of x per step, >=4 steps when possible, and an even
    step count so v7x's two TensorCores get balanced work on the parallel axis."""
    bt = max(1, min(B, _TARGET_X_BYTES_PER_STEP // max(1, x_row_bytes)))
    if B >= 4:
        bt = min(bt, pl.cdiv(B, 4))                 # keep >= 4 grid steps for pipelining
    steps = pl.cdiv(B, bt)
    if B > 1 and steps % 2:
        for even_steps in range(steps + 1, 2 * B + 2, 2):
            cand = pl.cdiv(B, even_steps)
            if cand >= 1 and pl.cdiv(B, cand) % 2 == 0:
                bt = cand
                break
    return bt


def _pos_enc_kernel(x_ref, pe0_ref, per_ref, o_ref):
    # x_ref  : (BT, S,  D)   batch tile of inputs
    # pe0_ref: (1,  1,  D)   cls_token + pe[0]  (folded on the wrapper side)
    # per_ref: (1,  S,  D)   pe[1:S+1]
    # o_ref  : (BT, S1, D)   output batch tile
    bt, _, d = x_ref.shape
    # Two direct stores -- no concatenate (would materialize a (BT,S1,D) VMEM temp and
    # sublane-shift the whole x tile). The single masked store at seq offset 1 is cheap.
    o_ref[:, 0:1, :] = jnp.broadcast_to(pe0_ref[...], (bt, 1, d)).astype(o_ref.dtype)
    o_ref[:, 1:, :] = (x_ref[...] + per_ref[...]).astype(o_ref.dtype)


def positional_encoding(x: jax.Array, cls_token: jax.Array, pe: jax.Array) -> jax.Array:
    """x: (B, S, D), cls_token: (1, 1, D), pe: (1, L>=S+1, D) -> (B, S+1, D)."""
    B, S, D = x.shape
    S1 = S + 1
    assert cls_token.shape == (1, 1, D)
    assert pe.shape[0] == 1 and pe.shape[2] == D and pe.shape[1] >= S1
    pe = pe[:, :S1, :]

    # Fold cls_token into PE row 0 (in f32), then cast both PE pieces to x.dtype so a
    # bf16 model stays bf16 end-to-end inside the kernel (halves HBM bytes).
    pe_row0 = (pe[:, 0:1, :] + cls_token).astype(x.dtype)   # (1, 1, D)
    pe_rest = pe[:, 1:, :].astype(x.dtype)                  # (1, S, D)

    itemsize = jnp.dtype(x.dtype).itemsize
    bt = _choose_batch_tile(B, S * D * itemsize)
    grid = (pl.cdiv(B, bt),)   # ragged last tile is masked by Pallas (no divisor hunt)

    vmem_limit = _vmem_limit_bytes()
    # Double-buffered x/out tiles plus the small constant-index PE blocks.
    tile_vmem = 2 * (bt * S * D + bt * S1 * D + S * D + D) * itemsize
    if tile_vmem > vmem_limit:
        raise ValueError(
            f"Batch tile needs {tile_vmem} B of VMEM > limit {vmem_limit} B even at "
            f"bt={bt}; this (S={S}, D={D}) requires sequence tiling.")

    flops = B * S * D                                         # one add per x element
    bytes_accessed = (B * S * D + B * S1 * D + S1 * D) * itemsize

    return pl.pallas_call(
        _pos_enc_kernel,
        out_shape=jax.ShapeDtypeStruct((B, S1, D), x.dtype),
        grid_spec=pltpu.PrefetchScalarGridSpec(
            num_scalar_prefetch=0,
            grid=grid,
            in_specs=[
                pl.BlockSpec((bt, S, D), lambda b: (b, 0, 0)),   # x, batch tile
                pl.BlockSpec((1, 1, D), lambda b: (0, 0, 0)),    # cls + pe[0], constant
                pl.BlockSpec((1, S, D), lambda b: (0, 0, 0)),    # pe[1:],      constant
            ],
            out_specs=pl.BlockSpec((bt, S1, D), lambda b: (b, 0, 0)),
        ),
        compiler_params=pltpu.CompilerParams(
            dimension_semantics=("parallel",),
            vmem_limit_bytes=vmem_limit,
        ),
        cost_estimate=pl.CostEstimate(
            flops=flops, transcendentals=0, bytes_accessed=bytes_accessed),
    )(x, pe_row0, pe_rest)


if __name__ == "__main__":
    # Small shapes consistent with the module: d_model=32, max_seq_length=9 -> x has seq=8.
    B, S, D = 2, 8, 32
    max_seq_length = S + 1

    key = jax.random.PRNGKey(0)
    kx, kcls = jax.random.split(key)

    x = jax.random.normal(kx, (B, S, D), dtype=jnp.float32)
    cls_token = jax.random.normal(kcls, (1, 1, D), dtype=jnp.float32)  # nn.Parameter(randn(1,1,d))
    pe = jnp.asarray(_build_pe_table(max_seq_length, D))[None, :, :]   # (1, S+1, D) buffer

    out = jax.block_until_ready(positional_encoding(x, cls_token, pe))

    # Reference check in plain JAX (same semantics as the PyTorch forward).
    ref = jnp.concatenate([jnp.broadcast_to(cls_token, (B, 1, D)), x], axis=1) + pe
    assert out.shape == (B, max_seq_length, D)
    np.testing.assert_allclose(np.asarray(out), np.asarray(ref), rtol=1e-6, atol=1e-6)

    print("KERNEL_OK")
</pallas_src>

<mosaic_0001>
module attributes {stable_mosaic.version = 11 : i64} {
  func.func @_pos_enc_kernel(%arg0: i32, %arg1: memref<1x8x32xf32, #tpu.memory_space<vmem>>, %arg2: memref<1x1x32xf32, #tpu.memory_space<vmem>>, %arg3: memref<1x8x32xf32, #tpu.memory_space<vmem>>, %arg4: memref<1x9x32xf32, #tpu.memory_space<vmem>>) attributes {dimension_semantics = [#tpu.dimension_semantics<parallel>], iteration_bounds = array<i64: 2>, scalar_prefetch = 0 : i64, scratch_operands = 0 : i64, tpu.core_type = #tpu.core_type<tc>, window_params = [{transform_indices = @transform_0, window_bounds = array<i64: 1, 8, 32>}, {pipeline_mode = #tpu.pipeline_mode<synchronous>, transform_indices = @transform_1, window_bounds = array<i64: 1, 1, 32>}, {pipeline_mode = #tpu.pipeline_mode<synchronous>, transform_indices = @transform_2, window_bounds = array<i64: 1, 8, 32>}, {transform_indices = @transform_3, window_bounds = array<i64: 1, 9, 32>}]} {
    %c0 = arith.constant 0 : index
    %c0_0 = arith.constant 0 : index
    %c0_1 = arith.constant 0 : index
    %0 = vector.load %arg2[%c0, %c0_0, %c0_1] : memref<1x1x32xf32, #tpu.memory_space<vmem>>, vector<1x1x32xf32>
    %c0_2 = arith.constant 0 : index
    %c0_3 = arith.constant 0 : index
    %c0_4 = arith.constant 0 : index
    %1 = vector.load %arg4[%c0_2, %c0_3, %c0_4] : memref<1x9x32xf32, #tpu.memory_space<vmem>>, vector<1x1x32xf32>
    tpu.vector_store %arg4[%c0_2, %c0_3, %c0_4], %0 {strides = array<i32>} : memref<1x9x32xf32, #tpu.memory_space<vmem>>, vector<1x1x32xf32>,
    %c0_5 = arith.constant 0 : index
    %c0_6 = arith.constant 0 : index
    %c0_7 = arith.constant 0 : index
    %2 = vector.load %arg1[%c0_5, %c0_6, %c0_7] : memref<1x8x32xf32, #tpu.memory_space<vmem>>, vector<1x8x32xf32>
    %c0_8 = arith.constant 0 : index
    %c0_9 = arith.constant 0 : index
    %c0_10 = arith.constant 0 : index
    %3 = vector.load %arg3[%c0_8, %c0_9, %c0_10] : memref<1x8x32xf32, #tpu.memory_space<vmem>>, vector<1x8x32xf32>
    %4 = arith.addf %2, %3 : vector<1x8x32xf32>
    %c0_11 = arith.constant 0 : index
    %c1 = arith.constant 1 : index
    %c0_12 = arith.constant 0 : index
    %5 = vector.load %arg4[%c0_11, %c1, %c0_12] : memref<1x9x32xf32, #tpu.memory_space<vmem>>, vector<1x8x32xf32>
    tpu.vector_store %arg4[%c0_11, %c1, %c0_12], %4 {strides = array<i32>} : memref<1x9x32xf32, #tpu.memory_space<vmem>>, vector<1x8x32xf32>,
    return
  }
  func.func @transform_0(%arg0: i32) -> (i32, i32, i32) {
    %c0_i32 = arith.constant 0 : i32
    %c0_i32_0 = arith.constant 0 : i32
    %c0_i32_1 = arith.constant 0 : i32
    return %arg0, %c0_i32, %c0_i32_0 : i32, i32, i32
  }
  func.func @transform_1(%arg0: i32) -> (i32, i32, i32) {
    %c0_i32 = arith.constant 0 : i32
    %c0_i32_0 = arith.constant 0 : i32
    %c0_i32_1 = arith.constant 0 : i32
    %c0_i32_2 = arith.constant 0 : i32
    return %c0_i32, %c0_i32_0, %c0_i32_1 : i32, i32, i32
  }
  func.func @transform_2(%arg0: i32) -> (i32, i32, i32) {
    %c0_i32 = arith.constant 0 : i32
    %c0_i32_0 = arith.constant 0 : i32
    %c0_i32_1 = arith.constant 0 : i32
    %c0_i32_2 = arith.constant 0 : i32
    return %c0_i32, %c0_i32_0, %c0_i32_1 : i32, i32, i32
  }
  func.func @transform_3(%arg0: i32) -> (i32, i32, i32) {
    %c0_i32 = arith.constant 0 : i32
    %c0_i32_0 = arith.constant 0 : i32
    %c0_i32_1 = arith.constant 0 : i32
    return %arg0, %c0_i32, %c0_i32_0 : i32, i32, i32
  }
}

</mosaic_0001>

<bundles_post_ra>
// kernel: tpu_custom_call.1
= control target key start
LH: loop header
LB: loop body
LE: loop exit
PB: predicated region body
PF: predicated region fallthrough
CT: control target
= control target key end

     0   :  { %8 = vsyncpa [#allocation3], 0  ;;  %s647_s0 = inlined_call_operand.hbm [shape: f32[2,8,32], index: 0, kind: input, shape index: {}]   ;;  %s648_s1 = inlined_call_operand.hbm [shape: f32[1,1,32], index: 1, kind: input, shape index: {}]   ;;  %s649_s2 = inlined_call_operand.hbm [shape: f32[1,8,32], index: 2, kind: input, shape index: {}]   ;;  %s650_s3 = inlined_call_operand.vmem [shape: f32[2,9,32], index: 3, kind: output, shape index: {}]  }
   0x1   :  { %10 = vsyncpa [#allocation3 + $0x1], 0 }
   0x2   :  { %11 = vsyncpa [#allocation5], 0  ;;  %s541_s12 = smov 0   ;;  %s543_s13 = smov 0  }
   0x3   :  { %s545_s14 = smov 0   ;;  %s547_s15 = smov 0  }
   0x4 LB: > { %s560_s16 = sadd.s32 4294967295, %s517_s15   ;;  %p37_p0 = scmp.ne.s32.totalorder %s509_s13, %s505_s12  ;;  %s517_s15 = sphi %s547_s15, %s657_s15   ;;  %s513_s14 = sphi %s545_s14, %s656_s14   ;;  %s509_s13 = sphi %s543_s13, %s655_s13   ;;  %s505_s12 = sphi %s541_s12, %s654_s12  }
   0x5   : > { %p38_p1 = scmp.eq.s32.totalorder %s560_s16, 0  ;;  %p314_p2 = scmp.ge.s32.totalorder %s517_s15, 1 }
   0x6   : > { %p116_p3 = scmp.lt.s32.totalorder %s517_s15, 3  ;;  %s128_s20 = sshll.u32 %s648_s1, 4  ;;  %s129_s20 = int_to_ptr.hbm [resolvable:$true] %s128_s20 }
   0x7   : > { %p568_p4 = por %p38_p1, %p37_p0  ;;  %s519_s22 = smov [#allocation4]  }
   0x8   : > { %p575_p5 = pnand %p314_p2, %p116_p3  ;;  %s130_s23 = sshll.u32 %s519_s22, 4  ;;  %s131_s23 = int_to_ptr.vmem [resolvable:$true] %s130_s23 }
   0x9   : > { %s140_s26 = sshll.u32 %s649_s2, 4  ;;  %s520_s27 = smov [#allocation6]   ;;  %s141_s26 = int_to_ptr.hbm [resolvable:$true] %s140_s26 }
   0xa   : > { %p339_p6 = pneg %p575_p5  ;;  %s142_s28 = sshll.u32 %s520_s27, 4  ;;  %s143_s28 = int_to_ptr.vmem [resolvable:$true] %s142_s28 }
   0xb   : > { %s587_s29 = sadd.s32 1, %s517_s15   ;;  %s24_s30 = sadd.s32 1, %s513_s14 }
   0xc   : > { %p340_p7 = pnand %p339_p6, %p38_p1  ;;  %s21_s4 = ssub.s32 %s517_s15, %s587_s29 }
   0xd   : > { %p31_p8 = scmp.ne.s32.totalorder %s513_s14, %s509_s13  ;;  %p22_p9 = scmp.eq.s32.totalorder %s21_s4, 0 }
   0xe   : > { %342 = dma.hbm_to_vmem [thread:$0]  (!%p340_p7), %s129_s20, 16, %s131_s23, [#allocation5]  }
   0xf   : > { %345 = dma.hbm_to_vmem [thread:$0]  (!%p340_p7), %s141_s26, 128, %s143_s28, [#allocation5]  }
  0x10   : > { %p32_p10 = scmp.eq.s32.totalorder %s517_s15, 0  ;;  %s153_s5 = sand.u32 1, %s513_s14  }
  0x11   : > { %s597_s6 = scalar_select %p22_p9, %s513_s14, %s24_s30  }
  0x12   : > { %p33_p11 = por %p32_p10, %p31_p8  ;;  %p352_p12 = scmp.lt.s32.totalorder %s517_s15, 2 }
  0x13   : > { %s318_s7 = sshll.u32 %s153_s5, 3  ;;  %s319_s8 = sshll.u32 %s517_s15, 3 }
  0x14   : > { %s161_s11 = scalar_lea.hbm %s647_s0, %s319_s8  ;;  %s157_s18 = scalar_lea.vmem [#allocation2], %s318_s7 }
  0x15   : > { %s163_s12 = sshll.u32 %s161_s11, 4  ;;  %s165_s19 = sshll.u32 %s157_s18, 4  ;;  %s164_s12 = int_to_ptr.hbm [resolvable:$true] %s163_s12  ;;  %s166_s19 = int_to_ptr.vmem [resolvable:$true] %s165_s19 }
  0x16   : > { %p604_p13 = pnand %p352_p12, %p33_p11  ;;  %s154_s22 = scalar_lea.sflag [#allocation3], %s153_s5 }
  0x17   : > { %s449_s23 = sshra.s32 %s164_s12, 4  ;;  %s456_s26 = scalar_lea.hbm %s647_s0, 16  ;;  %s450_s23 = int_to_ptr.hbm [resolvable:$true] %s449_s23 }
  0x18   : > { %s451_s24 = scalar_lea.hbm %s450_s23, 8  ;;  %p453_p2 = pneg %p604_p13 }
  0x19   : > { %p452_p0 = scmp.ne.s32.totalorder %s450_s23, %s451_s24  ;;  %p457_p7 = scmp.lt.s32.totalorder %s450_s23, %s647_s0 }
  0x1a   : > { %p458_p8 = scmp.lt.s32.totalorder %s456_s26, %s451_s24 }
  0x1b   : > { %p454_p3 = pnand %p453_p2, %p452_p0 }
  0x1c   : > { %p459_p9 = por %p458_p8, %p457_p7 }
  0x1d   : > { %p455_p6 = pneg %p454_p3 }
  0x1f   : > { %p460_p10 = pnand %p459_p9, %p455_p6 }
  0x21   : > { %463 = shalt.err (!%p460_p10)
}
  0x22   : > { %349 = dma.hbm_to_vmem [thread:$0]  (!%p604_p13), %s164_s12, 128, %s166_s19, %s154_s22  }
  0x23   : > { %174 = sbr.rel (%p575_p5) target bundleno = 50 (0x32), region = 32  ;;  %s176_s30 = sand.u32 (!%p575_p5), 1, %s509_s13  }
  0x24   : > { %s321_s4 = sshll.u32 (!%p575_p5), %s176_s30, 3  ;;  %s177_s5 = scalar_lea.sflag (!%p575_p5), [#allocation3], %s176_s30 }
  0x25   : > { %s180_s7 = scalar_lea.vmem (!%p575_p5), [#allocation2], %s321_s4 }
  0x28   : > { %496 = dma.done.wait (%p568_p4), %s177_s5, 128  }
  0x29   : > { %498 = vsyncadd (%p568_p4), %s177_s5, 4294967168 }
  0x2a   : > { %500 = dma.done.wait (%p38_p1), [#allocation5], 144  }
  0x2b   : > { %502 = vsyncadd (%p38_p1), [#allocation5], 4294967152  ;;  %p214_p5 = scmp.lt.s32.totalorder %s560_s16, 1  ;;  %vm220_vm0 = vcmask 253952   ;;  %v219_v0 = vld [vmem:[#allocation4] sm:$0x1] }
  0x2c   : > { %v222_v1 = vld [vmem:[%s180_s7] sm:$0xff]  ;;  %v223_v2 = vld [vmem:[#allocation6] sm:$0xff]  ;;  %vm225_vm1 = vcmask 261120  }
  0x2d   : > { %s659_s16 = smov (!%p214_p5, %s560_s16), 1  ;;  %v224_v3 = vadd.f32 %v223_v2, %v222_v1 }
  0x2e   : > { %s328_s21 = sshll.u32 %s659_s16, 4 }
  0x2f   : > { %s218_s10 = scalar_lea.vmem %s650_s3, %s328_s21 }
  0x30   : > { %221 = vst.msk [vmem:[%s218_s10] sm:$0x1] %vm220_vm0, %v219_v0 }
  0x31   : > { %226 = vst.msk [vmem:[%s218_s10 + $0x1] sm:$0xff] %vm225_vm1, %v224_v3 }
  0x32 PF: > { %p14_p1 = scmp.ge.s32.totalorder %s587_s29, 4   ;;  %s654_s12 = smov %s509_s13 }
  0x33   : > { %s655_s13 = smov %s513_s14  ;;  %s656_s14 = smov %s597_s6 }
  0x34   : > { %s657_s15 = smov %s587_s29  ;;  %16 = sbr.rel (!%p14_p1) target bundleno = 4 (0x4), region = 80 }
  0x39   :  { %248 = vsyncpa [#allocation3], 1 }
  0x3a   :  { %250 = vsyncpa [#allocation3 + $0x1], 1 }
  0x3b   :  { %251 = vsyncpa [#allocation5], 1 }

</bundles_post_ra>
